<compile_context>
chip_gen: v5e
topology: v5e:2x2
jax: 0.10.0
libtpu: 0.0.40
codegen_flags: <defaults>
</compile_context>

<pallas_src>
import functools

import jax
import jax.numpy as jnp
from jax.experimental import pallas as pl
from jax.experimental.pallas import tpu as pltpu


def _pair(v):
    if isinstance(v, (tuple, list)):
        assert len(v) == 2
        return int(v[0]), int(v[1])
    return int(v), int(v)


def _union_tap_offsets_1d(K, s, p, d):
    """Union (over all output residues r) of input offsets g for one axis.

    Output pixel oh = qh*s + r receives tap k iff oh = ih*s - p + k*d with
    ih = qh + g, i.e. g = (r + p - k*d)/s is an integer.
    """
    G = sorted({(r + p - k * d) // s
                for r in range(s) for k in range(K)
                if (r + p - k * d) % s == 0})
    return G if G else [0]


def _convt_merged_kernel(x_ref, w_ref, b_ref, o_ref, xstk_ref, *,
                         deltas, cin, lout, nb):
    """One grid step = NB batch images, all s*s phases, ONE MXU matmul.

    x_ref   : (NB, Cin, XLEN)       halo-padded, row-major-flattened NCHW input
    w_ref   : (Cout*P, U*Cin)       (cout, phase)-ordered union-tap weight
    b_ref   : (Cout*P, 1)           bias repeated per phase (f32)
    o_ref   : (NB, Cout*P, LOUT)    per-phase output slabs (lane-dense, 128-mult)
    xstk_ref: (U*Cin, NB*LOUT) VMEM union-tap im2col scratch
    """
    # Build the union im2col stack (static unroll; every tap is a static
    # lane-offset window of the flattened halo image -> no relayout).
    for n in range(nb):
        col = n * lout
        for u, dlt in enumerate(deltas):
            xstk_ref[u * cin:(u + 1) * cin, col:col + lout] = \
                x_ref[n, :, dlt:dlt + lout]
    # ONE MXU matmul per grid step: (Cout*P, U*Cin) @ (U*Cin, NB*LOUT), f32 acc.
    acc = jnp.dot(w_ref[...], xstk_ref[...],
                  preferred_element_type=jnp.float32)
    acc = acc + b_ref[...].astype(jnp.float32)
    for n in range(nb):
        o_ref[n, :, :] = acc[:, n * lout:(n + 1) * lout].astype(o_ref.dtype)


def conv_transpose2d(x, weight, bias, *, stride, padding, output_padding,
                     dilation, groups=1, compute_dtype=jnp.float32,
                     vmem_budget_bytes=40 * 1024 * 1024):
    """PyTorch-semantics conv_transpose2d.

    x      : (N, Cin, H, W)            NCHW
    weight : (Cin, Cout//groups, K, K) PyTorch conv-transpose weight layout
    bias   : (Cout,)
    returns: (N, Cout, Ho, Wo)         NCHW
    """
    assert groups == 1  # TODO(synk): grouped conv-transpose not implemented
    N, Cin, H, W = x.shape
    _, Cout, KH, KW = weight.shape
    sh, sw = _pair(stride)
    ph, pw = _pair(padding)
    oph, opw = _pair(output_padding)
    dh, dw = _pair(dilation)
    out_dtype = x.dtype

    Ho = (H - 1) * sh - 2 * ph + dh * (KH - 1) + oph + 1
    Wo = (W - 1) * sw - 2 * pw + dw * (KW - 1) + opw + 1
    HQ, WQ = -(-Ho // sh), -(-Wo // sw)      # per-phase output extents
    P = sh * sw

    # ---- static phase / union-tap structure (pure Python, compile time) ----
    Gh = _union_tap_offsets_1d(KH, sh, ph, dh)
    Gw = _union_tap_offsets_1d(KW, sw, pw, dw)
    Uh, Uw = len(Gh), len(Gw)
    U = Uh * Uw

    pad_t = max(0, -Gh[0])
    pad_b = max(0, Gh[-1] + HQ - 1 - (H - 1))
    pad_l = max(0, -Gw[0])
    pad_r = max(0, Gw[-1] + WQ - 1 - (W - 1))
    Wh = W + pad_l + pad_r
    Hh = H + pad_t + pad_b
    LOUT = -(-(HQ * Wh) // 128) * 128        # lane-dense (128-mult) slab width

    # Static lane offsets of every union tap into the flattened halo image,
    # ordered (gh, gw) to match the weight column blocks below.
    deltas = tuple((gh + pad_t) * Wh + (gw + pad_l) for gh in Gh for gw in Gw)
    # Fold the flat tail padding (windows reach delta_max + LOUT) into the
    # halo pad so the input needs exactly ONE jnp.pad.
    xlen_needed = max(deltas) + LOUT
    extra_rows = max(0, -(-(xlen_needed - Hh * Wh) // Wh))
    Hh += extra_rows
    XLEN = Hh * Wh

    # ---- merged weight: (Cout*P, U*Cin), rows ordered (cout, phase) --------
    # Row (c, p=(rh,rw)), column block (u=(gh,gw), ci) = weight[ci, c, kh, kw]
    # with kh = (rh + ph - gh*sh)/dh (analogously kw) when that tap exists,
    # else zero (ragged phases / unused union combinations).
    zero_blk = jnp.zeros((Cout, Cin), weight.dtype)
    w_rows = []
    for rh in range(sh):
        for rw in range(sw):
            cols = []
            for gh in Gh:
                nh = rh + ph - gh * sh
                kh = nh // dh if (nh >= 0 and nh % dh == 0) else -1
                for gw in Gw:
                    nw = rw + pw - gw * sw
                    kw_ = nw // dw if (nw >= 0 and nw % dw == 0) else -1
                    if 0 <= kh < KH and 0 <= kw_ < KW:
                        cols.append(weight[:, :, kh, kw_].T)    # (Cout, Cin)
                    else:
                        cols.append(zero_blk)
            w_rows.append(jnp.concatenate(cols, axis=1))        # (Cout, U*Cin)
    w_stk = jnp.transpose(jnp.stack(w_rows, axis=0), (1, 0, 2))  # (Cout,P,UCin)
    w_stk = w_stk.reshape(Cout * P, U * Cin).astype(compute_dtype)
    b2 = jnp.repeat(bias.astype(jnp.float32), P).reshape(Cout * P, 1)

    # ---- NB batch images per grid step, sized to the VMEM budget -----------
    esz_c = jnp.dtype(compute_dtype).itemsize
    esz_o = jnp.dtype(out_dtype).itemsize
    per_img = (2 * Cin * XLEN * esz_c            # double-buffered input block
               + U * Cin * LOUT * esz_c          # im2col scratch
               + 2 * Cout * P * LOUT * esz_o)    # double-buffered output block
    fixed = 2 * (Cout * P * U * Cin) * esz_c + 2 * Cout * P * 4
    NB = int(max(1, min(N, 16,
                        (vmem_budget_bytes - fixed) // max(per_img, 1))))
    N_pad = -(-N // NB) * NB
    G = N_pad // NB

    # ---- glue: ONE pad (batch + halo + flat tail), then flatten ------------
    x_c = x.astype(compute_dtype)
    x_halo = jnp.pad(x_c, ((0, N_pad - N), (0, 0),
                           (pad_t, Hh - H - pad_t), (pad_l, pad_r)))
    x_flat = x_halo.reshape(N_pad, Cin, XLEN)

    kernel = functools.partial(_convt_merged_kernel, deltas=deltas,
                               cin=Cin, lout=LOUT, nb=NB)
    out = pl.pallas_call(
        kernel,
        out_shape=jax.ShapeDtypeStruct((N_pad, Cout * P, LOUT), out_dtype),
        grid=(G,),
        in_specs=[
            pl.BlockSpec((NB, Cin, XLEN), lambda g: (g, 0, 0)),
            # Weight / bias blocks are grid-invariant (never re-fetched across
            # grid steps); they are small relative to the activation blocks.
            pl.BlockSpec((Cout * P, U * Cin), lambda g: (0, 0)),
            pl.BlockSpec((Cout * P, 1), lambda g: (0, 0)),
        ],
        out_specs=pl.BlockSpec((NB, Cout * P, LOUT), lambda g: (g, 0, 0)),
        scratch_shapes=[pltpu.VMEM((U * Cin, NB * LOUT), compute_dtype)],
        compiler_params=pltpu.CompilerParams(
            dimension_semantics=("parallel",),
            vmem_limit_bytes=48 * 1024 * 1024),
    )(x_flat, w_stk, b2)

    # ---- epilogue: phase interleave.  (N, Cout) stay leading, so the
    # transpose only permutes trailing spatial/phase dims and fuses with crops.
    y = out[:, :, :HQ * Wh].reshape(N_pad, Cout, sh, sw, HQ, Wh)[..., :WQ]
    y = jnp.transpose(y, (0, 1, 4, 2, 5, 3)).reshape(
        N_pad, Cout, HQ * sh, WQ * sw)
    return y[:N, :, :Ho, :Wo]


def _ref_conv_transpose2d(x, weight, bias, *, stride, padding, output_padding,
                          dilation):
    """Pure-JAX reference (XLA) with identical PyTorch semantics."""
    sh, sw = _pair(stride)
    ph, pw = _pair(padding)
    oph, opw = _pair(output_padding)
    dh, dw = _pair(dilation)
    KH, KW = weight.shape[2], weight.shape[3]
    w_flip = jnp.flip(jnp.transpose(weight, (1, 0, 2, 3)), axis=(2, 3))
    pad_h = (dh * (KH - 1) - ph, dh * (KH - 1) - ph + oph)
    pad_w = (dw * (KW - 1) - pw, dw * (KW - 1) - pw + opw)
    y = jax.lax.conv_general_dilated(
        x, w_flip, window_strides=(1, 1), padding=(pad_h, pad_w),
        lhs_dilation=(sh, sw), rhs_dilation=(dh, dw),
        dimension_numbers=("NCHW", "OIHW", "NCHW"))
    return y + bias.reshape(1, -1, 1, 1)


if __name__ == "__main__":
    root = jax.random.PRNGKey(0)

    def run_case(case_id, *, N, Cin, H, W, Cout, K, stride, padding,
                 output_padding, dilation, compute_dtype, atol, rtol):
        kx, kw, kb = jax.random.split(jax.random.fold_in(root, case_id), 3)
        x = jax.random.normal(kx, (N, Cin, H, W), jnp.float32)
        # PyTorch ConvTranspose2d weight: (in_channels, out_channels//groups, kH, kW)
        weight = 0.1 * jax.random.normal(kw, (Cin, Cout, K, K), jnp.float32)
        bias = 0.1 * jax.random.normal(kb, (Cout,), jnp.float32)

        out = conv_transpose2d(
            x, weight, bias, stride=stride, padding=padding,
            output_padding=output_padding, dilation=dilation, groups=1,
            compute_dtype=compute_dtype)
        out = jax.block_until_ready(out)

        Ho = (H - 1) * stride - 2 * padding + dilation * (K - 1) + output_padding + 1
        Wo = (W - 1) * stride - 2 * padding + dilation * (K - 1) + output_padding + 1
        assert out.shape == (N, Cout, Ho, Wo), (case_id, out.shape)

        ref = _ref_conv_transpose2d(
            x, weight, bias, stride=stride, padding=padding,
            output_padding=output_padding, dilation=dilation)
        assert jnp.allclose(out, ref, atol=atol, rtol=rtol), (
            case_id, float(jnp.max(jnp.abs(out - ref))))

    # Module-implied hyperparameters (synthetic, deterministic); f32 MXU operands.
    run_case(0, N=2, Cin=4, H=16, W=16, Cout=8, K=3, stride=2, padding=1,
             output_padding=1, dilation=1, compute_dtype=jnp.float32,
             atol=1e-4, rtol=1e-4)
    # bf16 MXU operands (native path on v6e/v7x), f32 accumulation.
    run_case(1, N=2, Cin=4, H=16, W=16, Cout=8, K=3, stride=2, padding=1,
             output_padding=1, dilation=1, compute_dtype=jnp.bfloat16,
             atol=5e-2, rtol=5e-2)
    # Larger stride / even kernel: exercises ragged phases, negative tap
    # offsets (top/left halo) and output_padding.
    run_case(2, N=2, Cin=4, H=8, W=8, Cout=8, K=4, stride=3, padding=0,
             output_padding=1, dilation=1, compute_dtype=jnp.float32,
             atol=1e-4, rtol=1e-4)

    print("KERNEL_OK")
</pallas_src>

<mosaic_0001>
module attributes {stable_mosaic.version = 11 : i64} {
  func.func @_convt_merged_kernel(%arg0: i32, %arg1: memref<2x4x408xf32, #tpu.memory_space<vmem>>, %arg2: memref<32x16xf32, #tpu.memory_space<vmem>>, %arg3: memref<32x1xf32, #tpu.memory_space<vmem>>, %arg4: memref<2x32x384xf32, #tpu.memory_space<vmem>>, %arg5: memref<16x768xf32, #tpu.memory_space<vmem>>) attributes {dimension_semantics = [#tpu.dimension_semantics<parallel>], iteration_bounds = array<i64: 1>, scalar_prefetch = 0 : i64, scratch_operands = 1 : i64, tpu.core_type = #tpu.core_type<tc>, window_params = [{transform_indices = @transform_0, window_bounds = array<i64: 2, 4, 408>}, {pipeline_mode = #tpu.pipeline_mode<synchronous>, transform_indices = @transform_1, window_bounds = array<i64: 32, 16>}, {pipeline_mode = #tpu.pipeline_mode<synchronous>, transform_indices = @transform_2, window_bounds = array<i64: 32, 1>}, {transform_indices = @transform_3, window_bounds = array<i64: 2, 32, 384>}]} {
    %c0 = arith.constant 0 : index
    %c0_0 = arith.constant 0 : index
    %c0_1 = arith.constant 0 : index
    %0 = vector.load %arg1[%c0, %c0_0, %c0_1] : memref<2x4x408xf32, #tpu.memory_space<vmem>>, vector<1x4x384xf32>
    %1 = vector.shape_cast %0 : vector<1x4x384xf32> to vector<4x384xf32>
    %c0_2 = arith.constant 0 : index
    %c0_3 = arith.constant 0 : index
    %2 = vector.load %arg5[%c0_2, %c0_3] : memref<16x768xf32, #tpu.memory_space<vmem>>, vector<4x384xf32>
    tpu.vector_store %arg5[%c0_2, %c0_3], %1 {strides = array<i32>} : memref<16x768xf32, #tpu.memory_space<vmem>>, vector<4x384xf32>,
    %c0_4 = arith.constant 0 : index
    %c0_5 = arith.constant 0 : index
    %c1 = arith.constant 1 : index
    %3 = vector.load %arg1[%c0_4, %c0_5, %c1] : memref<2x4x408xf32, #tpu.memory_space<vmem>>, vector<1x4x384xf32>
    %4 = vector.shape_cast %3 : vector<1x4x384xf32> to vector<4x384xf32>
    %c4 = arith.constant 4 : index
    %c0_6 = arith.constant 0 : index
    %5 = vector.load %arg5[%c4, %c0_6] : memref<16x768xf32, #tpu.memory_space<vmem>>, vector<4x384xf32>
    tpu.vector_store %arg5[%c4, %c0_6], %4 {strides = array<i32>} : memref<16x768xf32, #tpu.memory_space<vmem>>, vector<4x384xf32>,
    %c0_7 = arith.constant 0 : index
    %c0_8 = arith.constant 0 : index
    %c17 = arith.constant 17 : index
    %6 = vector.load %arg1[%c0_7, %c0_8, %c17] : memref<2x4x408xf32, #tpu.memory_space<vmem>>, vector<1x4x384xf32>
    %7 = vector.shape_cast %6 : vector<1x4x384xf32> to vector<4x384xf32>
    %c8 = arith.constant 8 : index
    %c0_9 = arith.constant 0 : index
    %8 = vector.load %arg5[%c8, %c0_9] : memref<16x768xf32, #tpu.memory_space<vmem>>, vector<4x384xf32>
    tpu.vector_store %arg5[%c8, %c0_9], %7 {strides = array<i32>} : memref<16x768xf32, #tpu.memory_space<vmem>>, vector<4x384xf32>,
    %c0_10 = arith.constant 0 : index
    %c0_11 = arith.constant 0 : index
    %c18 = arith.constant 18 : index
    %9 = vector.load %arg1[%c0_10, %c0_11, %c18] : memref<2x4x408xf32, #tpu.memory_space<vmem>>, vector<1x4x384xf32>
    %10 = vector.shape_cast %9 : vector<1x4x384xf32> to vector<4x384xf32>
    %c12 = arith.constant 12 : index
    %c0_12 = arith.constant 0 : index
    %11 = vector.load %arg5[%c12, %c0_12] : memref<16x768xf32, #tpu.memory_space<vmem>>, vector<4x384xf32>
    tpu.vector_store %arg5[%c12, %c0_12], %10 {strides = array<i32>} : memref<16x768xf32, #tpu.memory_space<vmem>>, vector<4x384xf32>,
    %c1_13 = arith.constant 1 : index
    %c0_14 = arith.constant 0 : index
    %c0_15 = arith.constant 0 : index
    %12 = vector.load %arg1[%c1_13, %c0_14, %c0_15] : memref<2x4x408xf32, #tpu.memory_space<vmem>>, vector<1x4x384xf32>
    %13 = vector.shape_cast %12 : vector<1x4x384xf32> to vector<4x384xf32>
    %c0_16 = arith.constant 0 : index
    %c384 = arith.constant 384 : index
    %14 = vector.load %arg5[%c0_16, %c384] : memref<16x768xf32, #tpu.memory_space<vmem>>, vector<4x384xf32>
    tpu.vector_store %arg5[%c0_16, %c384], %13 {strides = array<i32>} : memref<16x768xf32, #tpu.memory_space<vmem>>, vector<4x384xf32>,
    %c1_17 = arith.constant 1 : index
    %c0_18 = arith.constant 0 : index
    %c1_19 = arith.constant 1 : index
    %15 = vector.load %arg1[%c1_17, %c0_18, %c1_19] : memref<2x4x408xf32, #tpu.memory_space<vmem>>, vector<1x4x384xf32>
    %16 = vector.shape_cast %15 : vector<1x4x384xf32> to vector<4x384xf32>
    %c4_20 = arith.constant 4 : index
    %c384_21 = arith.constant 384 : index
    %17 = vector.load %arg5[%c4_20, %c384_21] : memref<16x768xf32, #tpu.memory_space<vmem>>, vector<4x384xf32>
    tpu.vector_store %arg5[%c4_20, %c384_21], %16 {strides = array<i32>} : memref<16x768xf32, #tpu.memory_space<vmem>>, vector<4x384xf32>,
    %c1_22 = arith.constant 1 : index
    %c0_23 = arith.constant 0 : index
    %c17_24 = arith.constant 17 : index
    %18 = vector.load %arg1[%c1_22, %c0_23, %c17_24] : memref<2x4x408xf32, #tpu.memory_space<vmem>>, vector<1x4x384xf32>
    %19 = vector.shape_cast %18 : vector<1x4x384xf32> to vector<4x384xf32>
    %c8_25 = arith.constant 8 : index
    %c384_26 = arith.constant 384 : index
    %20 = vector.load %arg5[%c8_25, %c384_26] : memref<16x768xf32, #tpu.memory_space<vmem>>, vector<4x384xf32>
    tpu.vector_store %arg5[%c8_25, %c384_26], %19 {strides = array<i32>} : memref<16x768xf32, #tpu.memory_space<vmem>>, vector<4x384xf32>,
    %c1_27 = arith.constant 1 : index
    %c0_28 = arith.constant 0 : index
    %c18_29 = arith.constant 18 : index
    %21 = vector.load %arg1[%c1_27, %c0_28, %c18_29] : memref<2x4x408xf32, #tpu.memory_space<vmem>>, vector<1x4x384xf32>
    %22 = vector.shape_cast %21 : vector<1x4x384xf32> to vector<4x384xf32>
    %c12_30 = arith.constant 12 : index
    %c384_31 = arith.constant 384 : index
    %23 = vector.load %arg5[%c12_30, %c384_31] : memref<16x768xf32, #tpu.memory_space<vmem>>, vector<4x384xf32>
    tpu.vector_store %arg5[%c12_30, %c384_31], %22 {strides = array<i32>} : memref<16x768xf32, #tpu.memory_space<vmem>>, vector<4x384xf32>,
    %c0_32 = arith.constant 0 : index
    %c0_33 = arith.constant 0 : index
    %24 = vector.load %arg2[%c0_32, %c0_33] : memref<32x16xf32, #tpu.memory_space<vmem>>, vector<32x16xf32>
    %c0_34 = arith.constant 0 : index
    %c0_35 = arith.constant 0 : index
    %25 = vector.load %arg5[%c0_34, %c0_35] : memref<16x768xf32, #tpu.memory_space<vmem>>, vector<16x768xf32>
    %cst = arith.constant dense<0.000000e+00> : vector<32x768xf32>
    %26 = tpu.matmul %24, %25, %cst {dimension_numbers = #tpu.dot_dimension_numbers<[1], [0], [0], [1], [0, 0, 1, 1], [], []>} : vector<32x16xf32>, vector<16x768xf32>, vector<32x768xf32> -> vector<32x768xf32>
    %c0_36 = arith.constant 0 : index
    %c0_37 = arith.constant 0 : index
    %27 = vector.load %arg3[%c0_36, %c0_37] : memref<32x1xf32, #tpu.memory_space<vmem>>, vector<32x1xf32>
    %28 = vector.broadcast %27 : vector<32x1xf32> to vector<32x768xf32>
    %29 = arith.addf %26, %28 : vector<32x768xf32>
    %30 = vector.extract_strided_slice %29 {offsets = [0, 0], sizes = [32, 384], strides = [1, 1]} : vector<32x768xf32> to vector<32x384xf32>
    %c0_38 = arith.constant 0 : index
    %c0_39 = arith.constant 0 : index
    %c0_40 = arith.constant 0 : index
    %31 = vector.load %arg4[%c0_38, %c0_39, %c0_40] : memref<2x32x384xf32, #tpu.memory_space<vmem>>, vector<1x32x384xf32>
    %32 = vector.shape_cast %31 : vector<1x32x384xf32> to vector<32x384xf32>
    %33 = vector.shape_cast %30 : vector<32x384xf32> to vector<1x32x384xf32>
    tpu.vector_store %arg4[%c0_38, %c0_39, %c0_40], %33 {strides = array<i32>} : memref<2x32x384xf32, #tpu.memory_space<vmem>>, vector<1x32x384xf32>,
    %34 = vector.extract_strided_slice %29 {offsets = [0, 384], sizes = [32, 384], strides = [1, 1]} : vector<32x768xf32> to vector<32x384xf32>
    %c1_41 = arith.constant 1 : index
    %c0_42 = arith.constant 0 : index
    %c0_43 = arith.constant 0 : index
    %35 = vector.load %arg4[%c1_41, %c0_42, %c0_43] : memref<2x32x384xf32, #tpu.memory_space<vmem>>, vector<1x32x384xf32>
    %36 = vector.shape_cast %35 : vector<1x32x384xf32> to vector<32x384xf32>
    %37 = vector.shape_cast %34 : vector<32x384xf32> to vector<1x32x384xf32>
    tpu.vector_store %arg4[%c1_41, %c0_42, %c0_43], %37 {strides = array<i32>} : memref<2x32x384xf32, #tpu.memory_space<vmem>>, vector<1x32x384xf32>,
    return
  }
  func.func @transform_0(%arg0: i32) -> (i32, i32, i32) {
    %c0_i32 = arith.constant 0 : i32
    %c0_i32_0 = arith.constant 0 : i32
    %c0_i32_1 = arith.constant 0 : i32
    return %arg0, %c0_i32, %c0_i32_0 : i32, i32, i32
  }
  func.func @transform_1(%arg0: i32) -> (i32, i32) {
    %c0_i32 = arith.constant 0 : i32
    %c0_i32_0 = arith.constant 0 : i32
    %c0_i32_1 = arith.constant 0 : i32
    return %c0_i32, %c0_i32_0 : i32, i32
  }
  func.func @transform_2(%arg0: i32) -> (i32, i32) {
    %c0_i32 = arith.constant 0 : i32
    %c0_i32_0 = arith.constant 0 : i32
    %c0_i32_1 = arith.constant 0 : i32
    return %c0_i32, %c0_i32_0 : i32, i32
  }
  func.func @transform_3(%arg0: i32) -> (i32, i32, i32) {
    %c0_i32 = arith.constant 0 : i32
    %c0_i32_0 = arith.constant 0 : i32
    %c0_i32_1 = arith.constant 0 : i32
    return %arg0, %c0_i32, %c0_i32_0 : i32, i32, i32
  }
}

</mosaic_0001>

<bundles_post_ra>
// kernel: tpu_custom_call.1
= control target key start
LH: loop header
LB: loop body
LE: loop exit
PB: predicated region body
PF: predicated region fallthrough
CT: control target
= control target key end

     0   :  { %s731_s0 = inlined_call_operand.vmem [shape: f32[2,4,408], index: 0, kind: input, shape index: {}]   ;;  %s732_s1 = inlined_call_operand.vmem [shape: f32[32,16], index: 1, kind: input, shape index: {}]   ;;  %s733_s2 = inlined_call_operand.vmem [shape: f32[32,1], index: 2, kind: input, shape index: {}]   ;;  %s734_s3 = inlined_call_operand.hbm [shape: f32[2,32,384], index: 3, kind: output, shape index: {}]  }
   0x1   :  { %v15_v0 = vld [vmem:[%s731_s0] sm:$0xff]  ;;  %v16_v1 = vld [vmem:[%s731_s0 + $0x8] sm:$0xf] }
   0x2   :  { %19 = vst [vmem:[#allocation1] ss:$2 sm:$0xff] %v15_v0 }
   0x3   :  { %8 = vsyncpa [#allocation4], 0  ;;  %21 = vst [vmem:[#allocation1 + $0x10] ss:$2 sm:$0xff] %v16_v1  ;;  %v32_v5 = vld [vmem:[%s731_s0 + $0x8] sm:$0xff]  ;;  %s565_s18 = smov 127  }
   0x4   :  { %s566_s19 = smov 111   ;;  %v493_v14 = vld [vmem:[%s731_s0 + $0x10] sm:$0xff]  ;;  %s567_s22 = smov 110   ;;  %v494_v17 = vld [vmem:[%s731_s0 + $0x18] sm:$0xf]  ;;  %vm51_vm0 = vcmask 1039360  }
   0x5   :  { %v496_v22 = vld [vmem:[%s731_s0 + $0x18] sm:$0xff]  ;;  %vm110_vm1 = vcmask 900096   ;;  %vm80_vm2 = vcmask 908288   ;;  %v647_v61 = vld [vmem:[%s732_s1 + $0x10] sm:$0xff]  ;;  %vm263_vm3 = vcmask 130048   ;;  %v652_v63 = vld [vmem:[%s732_s1] sm:$0xff] }
   0x6   :  { %s481_s17 = sshll.u32 %s734_s3, 4  ;;  %s482_s17 = int_to_ptr.hbm [resolvable:$true] %s481_s17 }
   0x9   :  { %v22_v2 = vld.sshfl [vmem:[#allocation1] sm:$0xff pattern:$0x75316420]  ;;  %v23_v3 = vld.sshfl [vmem:[#allocation1 + $0x8] sm:$0xff pattern:$0x75316420] }
   0xa   :  { %36 = vst [vmem:[#allocation1 + $0x1] ss:$2 sm:$0xff] %v15_v0  ;;  %v24_v4 = vld.sshfl [vmem:[#allocation1 + $0x10] sm:$0xff pattern:$0x75316420] }
   0xb   :  { %28 = vst [vmem:[#allocation2 + $0x18] sm:$0xf] %v22_v2 }
   0xc   :  { %29 = vst [vmem:[#allocation2] sm:$0xf] %v23_v3 }
   0xd   :  { %38 = vst [vmem:[#allocation1 + $0x11] ss:$2 sm:$0xff] %v32_v5 }
   0xe   :  { %30 = vst [vmem:[#allocation2 + $0x58] sm:$0xf] %v24_v4 }
  0x11   :  { %v40_v6 = vld.sshfl [vmem:[#allocation1 + $0x8] sm:$0xff pattern:$0x75316420]  ;;  %v39_v7 = vld.sshfl [vmem:[#allocation1] sm:$0xff pattern:$0x75316420] }
  0x12   :  { %45 = vrot.lane.b32.xlu1 %v40_v6, %s565_s18  ;;  %43 = vrot.lane.b32.xlu0 %v39_v7, %s565_s18  ;;  %65 = vst [vmem:[#allocation1] ss:$2 sm:$0xff] %v15_v0  ;;  %v668_v6 = vld [vmem:[%s732_s1 + $0x18] sm:$0xff]  ;;  %v568_v7 = vmov 0  }
  0x13   :  { %537 = vset.pattern.permute.xlu1 %v568_v7  ;;  %536 = vset.pattern.permute.xlu0 %v568_v7 }
  0x14   :  { %v41_v8 = vld.sshfl [vmem:[#allocation1 + $0x10] sm:$0xff pattern:$0x75316420]  ;;  %v42_v9 = vld.sshfl [vmem:[#allocation1 + $0x18] sm:$0xff pattern:$0x75316420]  ;;  %538 = vset.pattern.permute.xlu2 %v568_v7 }
  0x15   :  { %67 = vst [vmem:[#allocation1 + $0x10] ss:$2 sm:$0xff] %v32_v5  ;;  %47 = vrot.lane.b32.xlu2 %v41_v8, %s565_s18  ;;  %v239_v8 = vld [vmem:[%s733_s2] sm:$0xff] }
  0x19   :  { %v68_v10 = vld.sshfl [vmem:[#allocation1] sm:$0xff pattern:$0x75316420]  ;;  %v69_v11 = vld.sshfl [vmem:[#allocation1 + $0x8] sm:$0xff pattern:$0x75316420] }
  0x1a   :  { %72 = vrot.lane.b32.xlu0 %v68_v10, %s566_s19  ;;  %95 = vst [vmem:[#allocation1 + $0x1] ss:$2 sm:$0xff] %v15_v0 }
  0x1c   :  { %v70_v12 = vld.sshfl [vmem:[#allocation1 + $0x10] sm:$0xff pattern:$0x75316420]  ;;  %v71_v13 = vld.sshfl [vmem:[#allocation1 + $0x18] sm:$0xff pattern:$0x75316420] }
  0x1d   :  { %76 = vrot.lane.b32.xlu1 %v70_v12, %s566_s19  ;;  %97 = vst [vmem:[#allocation1 + $0x11] ss:$2 sm:$0xff] %v32_v5 }
  0x21   :  { %v98_v15 = vld.sshfl [vmem:[#allocation1] sm:$0xff pattern:$0x75316420]  ;;  %v99_v16 = vld.sshfl [vmem:[#allocation1 + $0x8] sm:$0xff pattern:$0x75316420] }
  0x22   :  { %74 = vrot.lane.b32.xlu0 %v69_v11, %s566_s19  ;;  %104 = vrot.lane.b32.xlu2 %v99_v16, %s567_s22  ;;  %125 = vst [vmem:[#allocation1] ss:$2 sm:$0xff] %v493_v14  ;;  %v224_v11 = vld [vmem:[%s732_s1 + $0x8] sm:$0xff]  ;;  %v242_v16 = vld [vmem:[%s733_s2 + $0x18] sm:$0xff] }
  0x24   :  { %v101_v18 = vld.sshfl [vmem:[#allocation1 + $0x18] sm:$0xff pattern:$0x75316420]  ;;  %v100_v19 = vld.sshfl [vmem:[#allocation1 + $0x10] sm:$0xff pattern:$0x75316420] }
  0x25   :  { %102 = vrot.lane.b32.xlu1 %v98_v15, %s567_s22  ;;  %127 = vst [vmem:[#allocation1 + $0x10] ss:$2 sm:$0xff] %v494_v17 }
  0x29   :  { %v128_v20 = vld.sshfl [vmem:[#allocation1] sm:$0xff pattern:$0x75316420]  ;;  %v129_v21 = vld.sshfl [vmem:[#allocation1 + $0x8] sm:$0xff pattern:$0x75316420] }
  0x2a   :  { %78 = vrot.lane.b32.xlu0 %v71_v13, %s566_s19  ;;  %134 = vst [vmem:[#allocation2 + $0x8] sm:$0xf] %v128_v20  ;;  %106 = vrot.lane.b32.xlu2 %v100_v19, %s567_s22 }
  0x2b   :  { %135 = vst [vmem:[#allocation2 + $0x20] sm:$0xf] %v129_v21 }
  0x2c   :  { %142 = vst [vmem:[#allocation1 + $0x1] ss:$2 sm:$0xff] %v493_v14  ;;  %v130_v23 = vld.sshfl [vmem:[#allocation1 + $0x10] sm:$0xff pattern:$0x75316420] }
  0x2d   :  { %108 = vrot.lane.b32.xlu1 %v101_v18, %s567_s22  ;;  %144 = vst [vmem:[#allocation1 + $0x11] ss:$2 sm:$0xff] %v496_v22 }
  0x2e   :  { %136 = vst [vmem:[#allocation2 + $0x40] sm:$0xf] %v130_v23 }
  0x32   :  { %49 = vrot.lane.b32.xlu0 %v42_v9, %s565_s18  ;;  %v240_v9 = vld [vmem:[%s733_s2 + $0x8] sm:$0xff] }
  0x33   :  { %v145_v24 = vld.sshfl [vmem:[#allocation1] sm:$0xff pattern:$0x75316420]  ;;  %v146_v25 = vld.sshfl [vmem:[#allocation1 + $0x8] sm:$0xff pattern:$0x75316420] }
  0x34   :  { %v147_v26 = vld.sshfl [vmem:[#allocation1 + $0x10] sm:$0xff pattern:$0x75316420]  ;;  %v148_v27 = vld.sshfl [vmem:[#allocation1 + $0x18] sm:$0xff pattern:$0x75316420]  ;;  %151 = vrot.lane.b32.xlu2 %v146_v25, %s565_s18 }
  0x35   :  { %149 = vrot.lane.b32.xlu1 %v145_v24, %s565_s18  ;;  %172 = vst [vmem:[#allocation1 + $0x10] ss:$2 sm:$0xff] %v496_v22 }
  0x36   :  { %170 = vst [vmem:[#allocation1] ss:$2 sm:$0xff] %v493_v14 }
  0x3c   :  { %v176_v28 = vld.sshfl [vmem:[#allocation1 + $0x18] sm:$0xff pattern:$0x75316420]  ;;  %v175_v29 = vld.sshfl [vmem:[#allocation1 + $0x10] sm:$0xff pattern:$0x75316420] }
  0x3d   :  { %183 = vrot.lane.b32.xlu1 %v176_v28, %s566_s19  ;;  %v174_v30 = vld.sshfl [vmem:[#allocation1 + $0x8] sm:$0xff pattern:$0x75316420]  ;;  %v173_v31 = vld.sshfl [vmem:[#allocation1] sm:$0xff pattern:$0x75316420] }
  0x3e   :  { %179 = vrot.lane.b32.xlu0 %v174_v30, %s566_s19  ;;  %199 = vst [vmem:[#allocation1 + $0x1] ss:$2 sm:$0xff] %v493_v14  ;;  %177 = vrot.lane.b32.xlu2 %v173_v31, %s566_s19 }
  0x3f   :  { %201 = vst [vmem:[#allocation1 + $0x11] ss:$2 sm:$0xff] %v496_v22 }
  0x45   :  { %v202_v32 = vld.sshfl [vmem:[#allocation1] sm:$0xff pattern:$0x75316420]  ;;  %v203_v33 = vld.sshfl [vmem:[#allocation1 + $0x8] sm:$0xff pattern:$0x75316420] }
  0x46   :  { %181 = vrot.lane.b32.xlu0 %v175_v29, %s566_s19  ;;  %206 = vrot.lane.b32.xlu1 %v202_v32, %s567_s22  ;;  %v205_v34 = vld.sshfl [vmem:[#allocation1 + $0x18] sm:$0xff pattern:$0x75316420]  ;;  %v204_v35 = vld.sshfl [vmem:[#allocation1 + $0x10] sm:$0xff pattern:$0x75316420] }
  0x47   :  { %208 = vrot.lane.b32.xlu2 %v203_v33, %s567_s22  ;;  %v241_v29 = vld [vmem:[%s733_s2 + $0x10] sm:$0xff]  ;;  %s569_s2 = smov [#allocation3]   ;;  %s571_s19 = smov 24  }
  0x48   :  { %s479_s14 = sshll.u32 %s569_s2, 4  ;;  %s480_s14 = int_to_ptr.vmem [resolvable:$true] %s479_s14 }
  0x4e   :  { %212 = vrot.lane.b32.xlu0 %v205_v34, %s567_s22  ;;  %153 = vrot.lane.b32.xlu1 %v147_v26, %s565_s18 }
  0x4f   :  { %210 = vrot.lane.b32.xlu2 %v204_v35, %s567_s22 }
  0x56   :  { %250 = vperm.xlu1 %537, %v240_v9   ;;  %245 = vperm.xlu0 %536, %v239_v8  }
  0x57   :  { %155 = vrot.lane.b32.xlu2 %v148_v27, %s565_s18  ;;  %s570_s18 = smov 384  }
  0x5e   :  { %260 = vperm.xlu1 %537, %v242_v16  }
  0x5f   :  { %255 = vperm.xlu2 %538, %v241_v29  }
  0x6f   :  { %v48_v36 = vpop.permute.xlu2 %47 }
  0x7c   :  { %v105_v37 = vpop.permute.xlu2 %104 }
  0x84   :  { %v46_v38 = vpop.permute.xlu1 %45  ;;  %v44_v39 = vpop.permute.xlu0 %43 }
  0x85   :  { %v53_v40 = vsel %vm51_vm0, %v46_v38, %v48_v36  ;;  %v52_v41 = vsel %vm51_vm0, %v44_v39, %v46_v38  ;;  %v107_v42 = vpop.permute.xlu2 %106 }
  0x86   :  { %59 = vst [vmem:[#allocation2] sm:$0xf0] %v53_v40  ;;  %v112_v43 = vsel %vm110_vm1, %v105_v37, %v107_v42 }
  0x87   :  { %58 = vst [vmem:[#allocation2 + $0x18] sm:$0xf0] %v52_v41 }
  0x88   :  { %118 = vst [vmem:[#allocation2 + $0x50] sm:$0xf0] %v112_v43 }
  0x8c   :  { %v73_v44 = vpop.permute.xlu0 %72 }
  0x8d   :  { %v228_v59 = vld [vmem:[#allocation2] sm:$0xff] }
  0x8e   :  { %v637_v45 = vpop.permute.xlu2 %151  ;;  %v227_v62 = vld [vmem:[#allocation2 + $0x18] sm:$0xff] }
  0x8f   :  { %v77_v46 = vpop.permute.xlu1 %76 }
  0x94   :  { %v75_v47 = vpop.permute.xlu0 %74 }
  0x95   :  { %v81_v48 = vsel %vm80_vm2, %v73_v44, %v75_v47  ;;  %v82_v49 = vsel %vm80_vm2, %v75_v47, %v77_v46 }
  0x96   :  { %87 = vst [vmem:[#allocation2 + $0x30] sm:$0xf] %v81_v48 }
  0x97   :  { %88 = vst [vmem:[#allocation2 + $0x50] sm:$0xf] %v82_v49  ;;  %v103_v50 = vpop.permute.xlu1 %102 }
  0x98   :  { %v111_v51 = vsel %vm110_vm1, %v103_v50, %v105_v37  ;;  %v178_v52 = vpop.permute.xlu2 %177 }
  0x99   :  { %117 = vst [vmem:[#allocation2 + $0x30] sm:$0xf0] %v111_v51 }
  0x9c   :  { %v79_v53 = vpop.permute.xlu0 %78 }
  0x9d   :  { %v83_v54 = vsel %vm80_vm2, %v77_v46, %v79_v53 }
  0x9e   :  { %89 = vst [vmem:[#allocation2 + $0x38] sm:$0xf] %v83_v54  ;;  %v234_v55 = vld [vmem:[#allocation2 + $0x50] sm:$0xff] }
  0x9f   :  { %v109_v56 = vpop.permute.xlu1 %108  ;;  %319 = vmatpush.msra.mxu1 %v234_v55  ;;  %527 = vmatpush.msra.mxu3 %v234_v55 }
  0xa0   :  { %v113_v57 = vsel %vm110_vm1, %v107_v42, %v109_v56  ;;  %v233_v58 = vld [vmem:[#allocation2 + $0x30] sm:$0xff] }
  0xa1   :  { %119 = vst [vmem:[#allocation2 + $0x38] sm:$0xf0] %v113_v57  ;;  %290 = vmatpush.msra.mxu0 %v233_v58  ;;  %525 = vmatpush.msra.mxu2 %v233_v58  ;;  %v209_v60 = vpop.permute.xlu2 %208 }
  0xa2   :  { %320 = vmatpush.msra.mxu1 %v228_v59  ;;  %528 = vmatpush.msra.mxu3 %v228_v59 }
  0xa3   :  { %291 = vmatpush.msra.mxu0 %v227_v62  ;;  %526 = vmatpush.msra.mxu2 %v227_v62 }
  0xa4   :  { %v50_v0 = vpop.permute.xlu0 %49  ;;  %503 = vmatmul.msk.f32.vlgmr.msra.gmra.mxu2 %vm263_vm3, %v647_v61  ;;  %507 = vmatmul.msk.f32.vlgmr.msra.gmra.mxu3 %vm263_vm3, %v647_v61 }
  0xa5   :  { %v54_v1 = vsel %vm51_vm0, %v48_v36, %v50_v0  ;;  %501 = vmatmul.msk.f32.vlgmr.msra.gmra.mxu0 %vm263_vm3, %v652_v63  ;;  %505 = vmatmul.msk.f32.vlgmr.msra.gmra.mxu1 %vm263_vm3, %v652_v63 }
  0xa6   :  { %60 = vst [vmem:[#allocation2 + $0x58] sm:$0xf0] %v54_v1 }
  0xa7   :  { %v150_v2 = vpop.permute.xlu1 %149 }
  0xa8   :  { %v157_v3 = vsel %vm51_vm0, %v150_v2, %v637_v45  ;;  %v235_v4 = vld [vmem:[#allocation2 + $0x38] sm:$0xff] }
  0xa9   :  { %163 = vst [vmem:[#allocation2 + $0x8] sm:$0xf0] %v157_v3  ;;  %348 = vmatpush.msrb.mxu2 %v235_v4  ;;  %v211_v5 = vpop.permute.xlu2 %210 }
  0xaa   :  { %v215_v10 = vsel %vm110_vm1, %v209_v60, %v211_v5 }
  0xab   :  { %221 = vst [vmem:[#allocation2 + $0x10] sm:$0xf0] %v215_v10 }
  0xac   :  { %504 = vmatmul.msk.f32.gmra.mxu2 %vm263_vm3, %v668_v6  ;;  %508 = vmatmul.msk.f32.gmra.mxu3 %vm263_vm3, %v668_v6 }
  0xad   :  { %v229_v12 = vld [vmem:[#allocation2 + $0x58] sm:$0xff]  ;;  %502 = vmatmul.msk.f32.gmra.mxu0 %vm263_vm3, %v224_v11  ;;  %506 = vmatmul.msk.f32.gmra.mxu1 %vm263_vm3, %v224_v11 }
  0xae   :  { %349 = vmatpush.msrb.mxu2 %v229_v12 }
  0xaf   :  { %v184_v13 = vpop.permute.xlu1 %183 }
  0xb0   :  { %v180_v14 = vpop.permute.xlu0 %179  ;;  %v230_v31 = vld [vmem:[#allocation2 + $0x8] sm:$0xff] }
  0xb1   :  { %v185_v15 = vsel %vm80_vm2, %v178_v52, %v180_v14  ;;  %v156_v22 = vpop.permute.xlu2 %155 }
  0xb2   :  { %191 = vst [vmem:[#allocation2 + $0x48] sm:$0xf] %v185_v15 }
  0xb4   :  { %509 = vmatmul.msk.f32.vlgmr.msrb.gmra.mxu2 %vm263_vm3, %v652_v63 }
  0xb8   :  { %v182_v17 = vpop.permute.xlu0 %181  ;;  %v207_v18 = vpop.permute.xlu1 %206 }
  0xb9   :  { %v186_v19 = vsel %vm80_vm2, %v180_v14, %v182_v17  ;;  %v187_v20 = vsel %vm80_vm2, %v182_v17, %v184_v13  ;;  %v214_v21 = vsel %vm110_vm1, %v207_v18, %v209_v60  ;;  %v256_v41 = vpop.permute.xlu2 %255 }
  0xba   :  { %192 = vst [vmem:[#allocation2 + $0x10] sm:$0xf] %v186_v19 }
  0xbb   :  { %193 = vst [vmem:[#allocation2 + $0x28] sm:$0xf] %v187_v20 }
  0xbc   :  { %220 = vst [vmem:[#allocation2 + $0x48] sm:$0xf0] %v214_v21  ;;  %510 = vmatmul.msk.f32.gmra.mxu2 %vm263_vm3, %v224_v11 }
  0xc0   :  { %v213_v23 = vpop.permute.xlu0 %212  ;;  %v154_v24 = vpop.permute.xlu1 %153 }
  0xc1   :  { %v216_v25 = vsel %vm110_vm1, %v211_v5, %v213_v23  ;;  %v158_v26 = vsel %vm51_vm0, %v637_v45, %v154_v24  ;;  %v237_v27 = vld [vmem:[#allocation2 + $0x10] sm:$0xff]  ;;  %v159_v28 = vsel %vm51_vm0, %v154_v24, %v156_v22 }
  0xc2   :  { %222 = vst [vmem:[#allocation2 + $0x28] sm:$0xf0] %v216_v25  ;;  %406 = vmatpush.msrb.mxu0 %v237_v27 }
  0xc3   :  { %164 = vst [vmem:[#allocation2 + $0x20] sm:$0xf0] %v158_v26  ;;  %v236_v30 = vld [vmem:[#allocation2 + $0x48] sm:$0xff] }
  0xc4   :  { %377 = vmatpush.msrb.mxu3 %v236_v30  ;;  %165 = vst [vmem:[#allocation2 + $0x40] sm:$0xf0] %v159_v28  ;;  %511 = vmatmul.msk.f32.gmra.mxu2 %vm263_vm3, %v647_v61 }
  0xc6   :  { %378 = vmatpush.msrb.mxu3 %v230_v31 }
  0xc7   :  { %513 = vmatmul.msk.f32.vlgmr.msrb.gmra.mxu3 %vm263_vm3, %v652_v63 }
  0xc8   :  { %v246_v35 = vpop.permute.xlu0 %245  ;;  %v251_v40 = vpop.permute.xlu1 %250 }
  0xc9   :  { %v238_v32 = vld [vmem:[#allocation2 + $0x28] sm:$0xff] }
  0xca   :  { %v231_v33 = vld [vmem:[#allocation2 + $0x20] sm:$0xff]  ;;  %435 = vmatpush.msrb.mxu1 %v238_v32 }
  0xcb   :  { %407 = vmatpush.msrb.mxu0 %v231_v33  ;;  %v232_v34 = vld [vmem:[#allocation2 + $0x40] sm:$0xff] }
  0xcc   :  { %436 = vmatpush.msrb.mxu1 %v232_v34  ;;  %517 = vmatmul.msk.f32.vlgmr.msrb.gmra.mxu0 %vm263_vm3, %v652_v63 }
  0xcd   :  { %521 = vmatmul.msk.f32.vlgmr.msrb.gmra.mxu1 %vm263_vm3, %v652_v63  ;;  %512 = vmatmul.msk.f32.gmra.mxu2 %vm263_vm3, %v668_v6 }
  0xcf   :  { %514 = vmatmul.msk.f32.gmra.mxu3 %vm263_vm3, %v224_v11 }
  0xd0   :  { %v261_v50 = vpop.permute.xlu1 %260 }
  0xd4   :  { %518 = vmatmul.msk.f32.gmra.mxu0 %vm263_vm3, %v224_v11 }
  0xd5   :  { %522 = vmatmul.msk.f32.gmra.mxu1 %vm263_vm3, %v224_v11 }
  0xd7   :  { %515 = vmatmul.msk.f32.gmra.mxu3 %vm263_vm3, %v647_v61 }
  0xdc   :  { %519 = vmatmul.msk.f32.gmra.mxu0 %vm263_vm3, %v647_v61 }
  0xdd   :  { %523 = vmatmul.msk.f32.gmra.mxu1 %vm263_vm3, %v647_v61 }
  0xdf   :  { %516 = vmatmul.msk.f32.gmra.mxu3 %vm263_vm3, %v668_v6 }
  0xe4   :  { %520 = vmatmul.msk.f32.gmra.mxu0 %vm263_vm3, %v668_v6 }
  0xe5   :  { %524 = vmatmul.msk.f32.gmra.mxu1 %vm263_vm3, %v668_v6 }
 0x122   :  { %v293_v36 = vpop.f32.mrf.mxu0  ;;  %v322_v37 = vpop.f32.mrf.mxu1 }
 0x123   :  { %v294_v38 = vadd.f32 %v293_v36, %v246_v35  ;;  %v323_v39 = vadd.f32 %v322_v37, %v246_v35 }
 0x125   :  { %450 = vst [vmem:[#allocation3] sm:$0xff] %v294_v38 }
 0x126   :  { %451 = vst [vmem:[#allocation3 + $0x8] sm:$0xff] %v323_v39 }
 0x127   :  { %v299_v42 = vpop.f32.mrf.mxu2  ;;  %v328_v43 = vpop.f32.mrf.mxu3 }
 0x128   :  { %v300_v44 = vadd.f32 %v299_v42, %v256_v41  ;;  %v329_v45 = vadd.f32 %v328_v43, %v256_v41 }
 0x12a   :  { %v325_v46 = vpop.f32.mrf.mxu1  ;;  %456 = vst [vmem:[#allocation3 + $0x30] sm:$0xff] %v300_v44  ;;  %v296_v47 = vpop.f32.mrf.mxu0 }
 0x12b   :  { %457 = vst [vmem:[#allocation3 + $0x38] sm:$0xff] %v329_v45  ;;  %v326_v48 = vadd.f32 %v325_v46, %v251_v40  ;;  %v297_v49 = vadd.f32 %v296_v47, %v251_v40 }
 0x12d   :  { %454 = vst [vmem:[#allocation3 + $0x20] sm:$0xff] %v326_v48 }
 0x12e   :  { %453 = vst [vmem:[#allocation3 + $0x18] sm:$0xff] %v297_v49 }
 0x12f   :  { %v331_v51 = vpop.f32.mrf.mxu3  ;;  %v302_v52 = vpop.f32.mrf.mxu2 }
 0x130   :  { %v303_v53 = vadd.f32 %v302_v52, %v261_v50  ;;  %v332_v54 = vadd.f32 %v331_v51, %v261_v50 }
 0x132   :  { %459 = vst [vmem:[#allocation3 + $0x48] sm:$0xff] %v303_v53 }
 0x133   :  { %460 = vst [vmem:[#allocation3 + $0x50] sm:$0xff] %v332_v54 }
 0x137   :  { %v351_v55 = vpop.f32.mrf.mxu2 }
 0x138   :  { %v352_v56 = vadd.f32 %v351_v55, %v246_v35 }
 0x13a   :  { %452 = vst [vmem:[#allocation3 + $0x10] sm:$0xff] %v352_v56 }
 0x13f   :  { %v354_v57 = vpop.f32.mrf.mxu2 }
 0x140   :  { %v355_v58 = vadd.f32 %v354_v57, %v251_v40 }
 0x142   :  { %455 = vst [vmem:[#allocation3 + $0x28] sm:$0xff] %v355_v58 }
 0x147   :  { %v357_v59 = vpop.f32.mrf.mxu2 }
 0x148   :  { %v358_v60 = vadd.f32 %v357_v59, %v256_v41 }
 0x149   :  { %v409_v61 = vpop.f32.mrf.mxu0 }
 0x14a   :  { %v438_v62 = vpop.f32.mrf.mxu1  ;;  %v380_v63 = vpop.f32.mrf.mxu3  ;;  %v410_v0 = vadd.f32 %v409_v61, %v246_v35  ;;  %458 = vst [vmem:[#allocation3 + $0x40] sm:$0xff] %v358_v60 }
 0x14b   :  { %v439_v1 = vadd.f32 %v438_v62, %v246_v35  ;;  %v381_v2 = vadd.f32 %v380_v63, %v246_v35 }
 0x14c   :  { %464 = vst [vmem:[#allocation3 + $0x68] sm:$0xff] %v410_v0 }
 0x14d   :  { %465 = vst [vmem:[#allocation3 + $0x70] sm:$0xff] %v439_v1 }
 0x14e   :  { %463 = vst [vmem:[#allocation3 + $0x60] sm:$0xff] %v381_v2 }
 0x150   :  { %v360_v3 = vpop.f32.mrf.mxu2 }
 0x151   :  { %v412_v4 = vpop.f32.mrf.mxu0  ;;  %v361_v5 = vadd.f32 %v360_v3, %v261_v50 }
 0x152   :  { %v383_v6 = vpop.f32.mrf.mxu3  ;;  %v413_v7 = vadd.f32 %v412_v4, %v251_v40  ;;  %v441_v8 = vpop.f32.mrf.mxu1 }
 0x153   :  { %v384_v9 = vadd.f32 %v383_v6, %v251_v40  ;;  %v442_v10 = vadd.f32 %v441_v8, %v251_v40  ;;  %461 = vst [vmem:[#allocation3 + $0x58] sm:$0xff] %v361_v5 }
 0x154   :  { %467 = vst [vmem:[#allocation3 + $0x80] sm:$0xff] %v413_v7 }
 0x155   :  { %466 = vst [vmem:[#allocation3 + $0x78] sm:$0xff] %v384_v9 }
 0x156   :  { %468 = vst [vmem:[#allocation3 + $0x88] sm:$0xff] %v442_v10 }
 0x159   :  { %v415_v11 = vpop.f32.mrf.mxu0 }
 0x15a   :  { %v386_v12 = vpop.f32.mrf.mxu3  ;;  %v416_v13 = vadd.f32 %v415_v11, %v256_v41  ;;  %v444_v14 = vpop.f32.mrf.mxu1 }
 0x15b   :  { %v387_v15 = vadd.f32 %v386_v12, %v256_v41  ;;  %v445_v16 = vadd.f32 %v444_v14, %v256_v41 }
 0x15c   :  { %470 = vst [vmem:[#allocation3 + $0x98] sm:$0xff] %v416_v13 }
 0x15d   :  { %469 = vst [vmem:[#allocation3 + $0x90] sm:$0xff] %v387_v15 }
 0x15e   :  { %471 = vst [vmem:[#allocation3 + $0xa0] sm:$0xff] %v445_v16 }
 0x161   :  { %v418_v17 = vpop.f32.mrf.mxu0 }
 0x162   :  { %v389_v18 = vpop.f32.mrf.mxu3  ;;  %v419_v19 = vadd.f32 %v418_v17, %v261_v50  ;;  %v447_v20 = vpop.f32.mrf.mxu1 }
 0x163   :  { %v390_v21 = vadd.f32 %v389_v18, %v261_v50  ;;  %v448_v22 = vadd.f32 %v447_v20, %v261_v50 }
 0x164   :  { %473 = vst [vmem:[#allocation3 + $0xb0] sm:$0xff] %v419_v19 }
 0x165   :  { %472 = vst [vmem:[#allocation3 + $0xa8] sm:$0xff] %v390_v21 }
 0x166   :  { %474 = vst [vmem:[#allocation3 + $0xb8] sm:$0xff] %v448_v22 }
 0x167   :  { %487 = dma.vmem_to_hbm [thread:$0]  %s480_s14, 3072, %s482_s17, [#allocation4], %s570_s18, %s570_s18, %s571_s19  }
 0x168   :  { %563 = dma.done.wait [#allocation4], 3072  }
 0x169   :  { %564 = vsyncadd [#allocation4], 4294964224 }
 0x16a   :  { %492 = vsyncpa [#allocation4], 1 }

</bundles_post_ra>
